<compile_context>
chip_gen: v7x
topology: tpu7x:2x2x1
jax: 0.10.0
libtpu: 0.0.40
codegen_flags: <defaults>
</compile_context>

<pallas_src>
import math

import jax
import jax.numpy as jnp
from jax.experimental import pallas as pl
from jax.experimental.pallas import tpu as pltpu

_MIB = 1024 * 1024


def _num_tensorcores_per_chip():
    """Best-effort TensorCores-per-chip count (only biases tile selection)."""
    try:
        kind = jax.devices()[0].device_kind.lower()
    except Exception:
        return 1
    if "v7" in kind or "7x" in kind:
        return 2  # v7x: 2 TensorCores per chip
    if "v4" in kind or "v5p" in kind:
        return 2  # megacore: 'parallel' grid axes shard across 2 TCs
    return 1      # v2/v3/v5e/v6e: single TensorCore


def _choose_graphs_per_block(batch, n_nodes, token_num, feat_dim, itemsize,
                             target_block_bytes, num_tensorcores):
    """Largest divisor G of `batch` whose in+out feature blocks fit the target.

    On multi-TC chips, prefer G that gives a grid length that is a multiple of
    the TC count (perfect core balance); on single-TC chips simply maximize G.
    Returns None when even a single graph exceeds the budget (row-tiled
    fallback must be used).
    """
    per_graph_bytes = (2 * n_nodes + token_num) * feat_dim * itemsize
    fitting = [g for g in range(1, batch + 1)
               if batch % g == 0 and g * per_graph_bytes <= target_block_bytes]
    if not fitting:
        return None
    if num_tensorcores > 1:
        balanced = [g for g in fitting
                    if (batch // g) >= num_tensorcores
                    and (batch // g) % num_tensorcores == 0]
        if balanced:
            return max(balanced)
    return max(fitting)


def _choose_row_tile(n_nodes, feat_dim, itemsize, target_block_bytes):
    """Row tile R (multiple of 8, divides N) so in+out row blocks fit budget."""
    per_row_bytes = 2 * feat_dim * itemsize          # one input row + one output row
    candidates = [r for r in range(8, n_nodes + 1, 8) if n_nodes % r == 0]
    fitting = [r for r in candidates if r * per_row_bytes <= target_block_bytes]
    return max(fitting) if fitting else min(candidates)


def _make_prompt_feat_kernel(n_nodes, token_num, graphs_per_block):
    N, T, G = n_nodes, token_num, graphs_per_block

    def kernel(tok_ref, x_ref, of_ref):
        # tok_ref: (T, D)        learned prompt token features (shared)
        # x_ref:   (G, N, D)     original node features for G graphs
        # of_ref:  (G, N+T, D)   prompted node features
        of_ref[:, :N, :] = x_ref[...]
        tok = tok_ref[...]
        of_ref[:, N:, :] = jnp.broadcast_to(tok, (G,) + tok.shape)

    return kernel


def _make_prompt_feat_rowtile_kernel(n_body_tiles, token_num):
    T = token_num

    def kernel(tok_ref, x_ref, of_ref):
        # tok_ref: (T, D); x_ref/of_ref: (1, R, D)
        r = pl.program_id(1)

        @pl.when(r < n_body_tiles)
        def _():
            of_ref[...] = x_ref[...]

        @pl.when(r == n_body_tiles)
        def _():
            # Final (partial) row tile holds the T prompt-token rows; rows
            # beyond N+T are outside the output array and masked on writeback.
            of_ref[0, :T, :] = tok_ref[...]

    return kernel


def prompted_graph_generation(node_feat, node_pos, token_parameter, token_position,
                               target_block_bytes=8 * _MIB):
    """Pallas implementation of ProteinPrompt.forward on a padded packed graph.

    node_feat: (B, N, D) float32
    node_pos:  (B, N, 3) float32
    token_parameter: (T, D) float32
    token_position:  (T, 3) float32
    returns (prompted_feat (B, N+T, D), prompted_pos (B, N+T, 3))
    """
    B, N, D = node_feat.shape
    T = token_parameter.shape[0]
    assert node_pos.shape == (B, N, 3)
    assert token_parameter.shape == (T, D)
    assert token_position.shape == (T, 3)
    itemsize = node_feat.dtype.itemsize

    # Positions have a 3-wide last dim; writing them inside the kernel would
    # force masked 3/128-lane stores, so this tiny concat is handled by XLA.
    out_pos = jnp.concatenate(
        [node_pos, jnp.broadcast_to(token_position[None], (B, T, 3))], axis=1
    )

    # Lane/sublane guard for real model sizes: narrow or unaligned last dims
    # would force masked vst.msk partial stores (the biggest measured lever),
    # so such shapes use plain XLA concat instead of a degraded kernel.
    if D % 128 != 0 or N % 8 != 0:
        out_feat = jnp.concatenate(
            [node_feat, jnp.broadcast_to(token_parameter[None], (B, T, D))], axis=1
        )
        return out_feat, out_pos

    cost = pl.CostEstimate(
        flops=0, transcendentals=0,
        bytes_accessed=int((B * N * D + B * (N + T) * D + T * D) * itemsize))

    num_tc = _num_tensorcores_per_chip()
    G = _choose_graphs_per_block(B, N, T, D, itemsize, target_block_bytes, num_tc)

    if G is not None and T <= N:
        # ---- Primary path: whole graphs per grid step -----------------------
        kernel = _make_prompt_feat_kernel(N, T, G)
        in_block = G * N * D * itemsize
        out_block = G * (N + T) * D * itemsize
        tok_block = max(T, 8) * D * itemsize
        vmem_limit = int(min(max(2 * (in_block + out_block + tok_block) + 2 * _MIB,
                                 32 * _MIB), 64 * _MIB))
        out_feat = pl.pallas_call(
            kernel,
            out_shape=jax.ShapeDtypeStruct((B, N + T, D), node_feat.dtype),
            grid_spec=pltpu.PrefetchScalarGridSpec(
                num_scalar_prefetch=0,
                grid=(B // G,),
                in_specs=[
                    # shared prompt parameters: same full (T, D) block every step
                    pl.BlockSpec((T, D), lambda b: (0, 0)),
                    # G graphs' node features per grid step (D on lanes)
                    pl.BlockSpec((G, N, D), lambda b: (b, 0, 0)),
                ],
                out_specs=pl.BlockSpec((G, N + T, D), lambda b: (b, 0, 0)),
            ),
            compiler_params=pltpu.CompilerParams(
                dimension_semantics=("parallel",),
                vmem_limit_bytes=vmem_limit,
            ),
            cost_estimate=cost,
        )(token_parameter, node_feat)
        return out_feat, out_pos

    # ---- Fallback path: row-tiled per graph (large N*D, bounded VMEM) -------
    R = _choose_row_tile(N, D, itemsize, target_block_bytes)
    if T > R:
        # Token rows would not fit a single trailing row tile; stay correct.
        out_feat = jnp.concatenate(
            [node_feat, jnp.broadcast_to(token_parameter[None], (B, T, D))], axis=1
        )
        return out_feat, out_pos

    n_body = N // R
    kernel = _make_prompt_feat_rowtile_kernel(n_body, T)
    row_block = R * D * itemsize
    tok_block = max(T, 8) * D * itemsize
    vmem_limit = int(min(max(2 * (2 * row_block + tok_block) + 2 * _MIB,
                             32 * _MIB), 64 * _MIB))

    out_feat = pl.pallas_call(
        kernel,
        out_shape=jax.ShapeDtypeStruct((B, N + T, D), node_feat.dtype),
        grid_spec=pltpu.PrefetchScalarGridSpec(
            num_scalar_prefetch=0,
            grid=(B, n_body + 1),
            in_specs=[
                pl.BlockSpec((T, D), lambda b, r: (0, 0)),
                # clamp the input block index on the token step (re-reads the
                # last valid block; its data is unused there)
                pl.BlockSpec((1, R, D),
                             lambda b, r: (b, jnp.minimum(r, n_body - 1), 0)),
            ],
            out_specs=pl.BlockSpec((1, R, D), lambda b, r: (b, r, 0)),
        ),
        compiler_params=pltpu.CompilerParams(
            dimension_semantics=("parallel", "arbitrary"),
            vmem_limit_bytes=vmem_limit,
        ),
        cost_estimate=cost,
    )(token_parameter, node_feat)

    # TODO(synk): edge/adjacency augmentation of prompted_graph_generation is
    # graph-library-specific (torchdrug PackedProtein) and has no clean dense
    # Pallas equivalent; only node feature/position prompting is implemented.
    return out_feat, out_pos


def init_protein_prompt_params(key, token_dim, token_num=4):
    """Deterministic re-implementation of ProteinPrompt.__init__ parameter init."""
    # kaiming_uniform_, mode='fan_in', nonlinearity='leaky_relu', a=0.01
    a = 0.01
    gain = math.sqrt(2.0 / (1.0 + a * a))
    fan_in = token_dim
    bound = gain * math.sqrt(3.0 / fan_in)
    token_parameter = jax.random.uniform(
        key, (token_num, token_dim), dtype=jnp.float32, minval=-bound, maxval=bound
    )
    token_position = jnp.zeros((token_num, 3), dtype=jnp.float32)
    return token_parameter, token_position


if __name__ == "__main__":
    key = jax.random.PRNGKey(0)
    k_tok, k_feat, k_pos = jax.random.split(key, 3)

    # Small packed-graph batch: B graphs, N padded nodes each, feature dim D.
    B, N, D, T = 8, 64, 128, 4

    token_parameter, token_position = init_protein_prompt_params(k_tok, D, T)
    node_feat = jax.random.normal(k_feat, (B, N, D), dtype=jnp.float32)
    node_pos = jax.random.normal(k_pos, (B, N, 3), dtype=jnp.float32)

    # Reference (plain JAX).
    ref_feat = jnp.concatenate(
        [node_feat, jnp.broadcast_to(token_parameter, (B, T, D))], axis=1
    )
    ref_pos = jnp.concatenate(
        [node_pos, jnp.broadcast_to(token_position, (B, T, 3))], axis=1
    )

    # 1) Primary path (whole-graph blocks, generation-aware G).
    out_feat, out_pos = prompted_graph_generation(
        node_feat, node_pos, token_parameter, token_position
    )
    out_feat = jax.block_until_ready(out_feat)
    out_pos = jax.block_until_ready(out_pos)
    assert out_feat.shape == (B, N + T, D)
    assert out_pos.shape == (B, N + T, 3)
    assert jnp.allclose(out_feat, ref_feat)
    assert jnp.allclose(out_pos, ref_pos)

    # 2) Row-tiled fallback path (forced by a tiny block budget) -- the path
    #    used when a single graph's feature block would exceed the VMEM budget.
    out_feat_rt, out_pos_rt = prompted_graph_generation(
        node_feat, node_pos, token_parameter, token_position,
        target_block_bytes=32 * 1024,
    )
    out_feat_rt = jax.block_until_ready(out_feat_rt)
    out_pos_rt = jax.block_until_ready(out_pos_rt)
    assert jnp.allclose(out_feat_rt, ref_feat)
    assert jnp.allclose(out_pos_rt, ref_pos)

    print("KERNEL_OK")
</pallas_src>

<mosaic_0001>
module attributes {stable_mosaic.version = 11 : i64} {
  func.func @kernel(%arg0: i32, %arg1: memref<4x128xf32, #tpu.memory_space<vmem>>, %arg2: memref<8x64x128xf32, #tpu.memory_space<vmem>>, %arg3: memref<8x68x128xf32, #tpu.memory_space<vmem>>) attributes {dimension_semantics = [#tpu.dimension_semantics<parallel>], iteration_bounds = array<i64: 1>, scalar_prefetch = 0 : i64, scratch_operands = 0 : i64, tpu.core_type = #tpu.core_type<tc>, window_params = [{pipeline_mode = #tpu.pipeline_mode<synchronous>, transform_indices = @transform_0, window_bounds = array<i64: 4, 128>}, {transform_indices = @transform_1, window_bounds = array<i64: 8, 64, 128>}, {transform_indices = @transform_2, window_bounds = array<i64: 8, 68, 128>}]} {
    %c0 = arith.constant 0 : index
    %c0_0 = arith.constant 0 : index
    %c0_1 = arith.constant 0 : index
    %0 = vector.load %arg2[%c0, %c0_0, %c0_1] : memref<8x64x128xf32, #tpu.memory_space<vmem>>, vector<8x64x128xf32>
    %c0_2 = arith.constant 0 : index
    %c0_3 = arith.constant 0 : index
    %c0_4 = arith.constant 0 : index
    %1 = vector.load %arg3[%c0_2, %c0_3, %c0_4] : memref<8x68x128xf32, #tpu.memory_space<vmem>>, vector<8x64x128xf32>
    tpu.vector_store %arg3[%c0_2, %c0_3, %c0_4], %0 {strides = array<i32>} : memref<8x68x128xf32, #tpu.memory_space<vmem>>, vector<8x64x128xf32>,
    %c0_5 = arith.constant 0 : index
    %c0_6 = arith.constant 0 : index
    %2 = vector.load %arg1[%c0_5, %c0_6] : memref<4x128xf32, #tpu.memory_space<vmem>>, vector<4x128xf32>
    %3 = vector.shape_cast %2 : vector<4x128xf32> to vector<1x4x128xf32>
    %4 = vector.broadcast %3 : vector<1x4x128xf32> to vector<8x4x128xf32>
    %c0_7 = arith.constant 0 : index
    %c64 = arith.constant 64 : index
    %c0_8 = arith.constant 0 : index
    %5 = vector.load %arg3[%c0_7, %c64, %c0_8] : memref<8x68x128xf32, #tpu.memory_space<vmem>>, vector<8x4x128xf32>
    tpu.vector_store %arg3[%c0_7, %c64, %c0_8], %4 {strides = array<i32>} : memref<8x68x128xf32, #tpu.memory_space<vmem>>, vector<8x4x128xf32>,
    return
  }
  func.func @transform_0(%arg0: i32) -> (i32, i32) {
    %c0_i32 = arith.constant 0 : i32
    %c0_i32_0 = arith.constant 0 : i32
    %c0_i32_1 = arith.constant 0 : i32
    return %c0_i32, %c0_i32_0 : i32, i32
  }
  func.func @transform_1(%arg0: i32) -> (i32, i32, i32) {
    %c0_i32 = arith.constant 0 : i32
    %c0_i32_0 = arith.constant 0 : i32
    %c0_i32_1 = arith.constant 0 : i32
    return %arg0, %c0_i32, %c0_i32_0 : i32, i32, i32
  }
  func.func @transform_2(%arg0: i32) -> (i32, i32, i32) {
    %c0_i32 = arith.constant 0 : i32
    %c0_i32_0 = arith.constant 0 : i32
    %c0_i32_1 = arith.constant 0 : i32
    return %arg0, %c0_i32, %c0_i32_0 : i32, i32, i32
  }
}

</mosaic_0001>

<bundles_post_ra>
// kernel: tpu_custom_call.1
= control target key start
LH: loop header
LB: loop body
LE: loop exit
PB: predicated region body
PF: predicated region fallthrough
CT: control target
= control target key end

     0   :  { %7 = vsyncpa [#allocation3], 0  ;;  %s498_s0 = inlined_call_operand.hbm [shape: f32[4,128], index: 0, kind: input, shape index: {}]   ;;  %s499_s1 = inlined_call_operand.hbm [shape: f32[8,64,128], index: 1, kind: input, shape index: {}]   ;;  %s500_s2 = inlined_call_operand.vmem [shape: f32[8,68,128], index: 2, kind: output, shape index: {}]  }
   0x1   :  { %8 = vsyncpa [#allocation5], 0  ;;  %s232_s9 = smov [#allocation2]   ;;  %s233_s11 = smov [#allocation4]  }
   0x2   :  { %s15_s10 = sshll.u32 %s232_s9, 4  ;;  %s24_s12 = sshll.u32 %s233_s11, 4  ;;  %s16_s10 = int_to_ptr.vmem [resolvable:$true] %s15_s10  ;;  %s251_s12 = int_to_ptr.vmem [resolvable:$true] %s24_s12 }
   0x3   :  { %s184_s15 = scalar_lea.hbm %s498_s0, 64 }
   0x4   :  { %p185_p0 = scmp.ne.s32.totalorder %s498_s0, %s184_s15  ;;  %p188_p1 = scmp.lt.u32.totalorder %s184_s15, %s498_s0 }
   0x6   :  { %p190_p2 = pnand %p188_p1, %p185_p0 }
   0x8   :  { %193 = shalt.err (!%p190_p2)
}
   0x9   :  { %s194_s20 = scalar_lea.vmem %s16_s10, 64  ;;  %p199_p4 = scmp.lt.s32.totalorder %s16_s10, %s16_s10 }
   0xa   :  { %p195_p3 = scmp.ne.s32.totalorder %s16_s10, %s194_s20  ;;  %p200_p5 = scmp.lt.s32.totalorder %s194_s20, %s194_s20 }
   0xc   :  { %p201_p6 = por %p200_p5, %p199_p4 }
   0xe   :  { %p202_p7 = pnand %p201_p6, %p195_p3 }
  0x10   :  { %205 = shalt.err (!%p202_p7)
}
  0x11   :  { %18 = dma.hbm_to_vmem [thread:$0]  %s498_s0, 64, %s16_s10, [#allocation3]  }
  0x12   :  { %s206_s25 = scalar_lea.hbm %s499_s1, 8192 }
  0x13   :  { %p207_p8 = scmp.ne.s32.totalorder %s499_s1, %s206_s25  ;;  %p210_p9 = scmp.lt.u32.totalorder %s206_s25, %s499_s1 }
  0x15   :  { %p212_p10 = pnand %p210_p9, %p207_p8 }
  0x17   :  { %215 = shalt.err (!%p212_p10)
}
  0x18   :  { %s216_s30 = scalar_lea.vmem %s251_s12, 8192  ;;  %p221_p12 = scmp.lt.s32.totalorder %s251_s12, %s251_s12 }
  0x19   :  { %p217_p11 = scmp.ne.s32.totalorder %s251_s12, %s216_s30  ;;  %p222_p13 = scmp.lt.s32.totalorder %s216_s30, %s216_s30 }
  0x1b   :  { %p223_p0 = por %p222_p13, %p221_p12 }
  0x1d   :  { %p224_p1 = pnand %p223_p0, %p217_p11 }
  0x1f   :  { %227 = shalt.err (!%p224_p1)
}
  0x20   :  { %s234_s0 = smov 128   ;;  %s235_s3 = smov 8  }
  0x21   :  { %30 = dma.hbm_to_vmem [thread:$0]  %s499_s1, 8192, %s251_s12, [#allocation5], %s234_s0, %s234_s0, %s235_s3  }
  0x22   :  { %228 = dma.done.wait [#allocation3], 64  }
  0x23   :  { %229 = vsyncadd [#allocation3], 4294967232 }
  0x24   :  { %230 = dma.done.wait [#allocation5], 8192  }
  0x25   :  { %231 = vsyncadd [#allocation5], 4294959104  ;;  %v37_v0 = vld [vmem:[#allocation4] sm:$0xff]  ;;  %v38_v1 = vld [vmem:[#allocation4 + $0x8] sm:$0xff] }
  0x26   :  { %v39_v2 = vld [vmem:[#allocation4 + $0x10] sm:$0xff]  ;;  %101 = vst [vmem:[%s500_s2] sm:$0xff] %v37_v0  ;;  %102 = vst [vmem:[%s500_s2 + $0x8] sm:$0xff] %v38_v1  ;;  %v40_v3 = vld [vmem:[#allocation4 + $0x18] sm:$0xff] }
  0x27   :  { %103 = vst [vmem:[%s500_s2 + $0x10] sm:$0xff] %v39_v2  ;;  %v41_v4 = vld [vmem:[#allocation4 + $0x20] sm:$0xff]  ;;  %v42_v5 = vld [vmem:[#allocation4 + $0x28] sm:$0xff]  ;;  %104 = vst [vmem:[%s500_s2 + $0x18] sm:$0xff] %v40_v3 }
  0x28   :  { %105 = vst [vmem:[%s500_s2 + $0x20] sm:$0xff] %v41_v4  ;;  %106 = vst [vmem:[%s500_s2 + $0x28] sm:$0xff] %v42_v5  ;;  %v43_v6 = vld [vmem:[#allocation4 + $0x30] sm:$0xff]  ;;  %v44_v7 = vld [vmem:[#allocation4 + $0x38] sm:$0xff] }
  0x29   :  { %v45_v8 = vld [vmem:[#allocation4 + $0x40] sm:$0xff]  ;;  %107 = vst [vmem:[%s500_s2 + $0x30] sm:$0xff] %v43_v6  ;;  %108 = vst [vmem:[%s500_s2 + $0x38] sm:$0xff] %v44_v7  ;;  %v46_v9 = vld [vmem:[#allocation4 + $0x48] sm:$0xff] }
  0x2a   :  { %109 = vst [vmem:[%s500_s2 + $0x48] sm:$0xff] %v45_v8  ;;  %v47_v10 = vld [vmem:[#allocation4 + $0x50] sm:$0xff]  ;;  %v48_v11 = vld [vmem:[#allocation4 + $0x58] sm:$0xff]  ;;  %110 = vst [vmem:[%s500_s2 + $0x50] sm:$0xff] %v46_v9 }
  0x2b   :  { %111 = vst [vmem:[%s500_s2 + $0x58] sm:$0xff] %v47_v10  ;;  %112 = vst [vmem:[%s500_s2 + $0x60] sm:$0xff] %v48_v11  ;;  %v49_v12 = vld [vmem:[#allocation4 + $0x60] sm:$0xff]  ;;  %v50_v13 = vld [vmem:[#allocation4 + $0x68] sm:$0xff] }
  0x2c   :  { %v51_v14 = vld [vmem:[#allocation4 + $0x70] sm:$0xff]  ;;  %113 = vst [vmem:[%s500_s2 + $0x68] sm:$0xff] %v49_v12  ;;  %114 = vst [vmem:[%s500_s2 + $0x70] sm:$0xff] %v50_v13  ;;  %v52_v15 = vld [vmem:[#allocation4 + $0x78] sm:$0xff] }
  0x2d   :  { %115 = vst [vmem:[%s500_s2 + $0x78] sm:$0xff] %v51_v14  ;;  %v53_v16 = vld [vmem:[#allocation4 + $0x80] sm:$0xff]  ;;  %v54_v17 = vld [vmem:[#allocation4 + $0x88] sm:$0xff]  ;;  %116 = vst [vmem:[%s500_s2 + $0x80] sm:$0xff] %v52_v15 }
  0x2e   :  { %117 = vst [vmem:[%s500_s2 + $0x90] sm:$0xff] %v53_v16  ;;  %118 = vst [vmem:[%s500_s2 + $0x98] sm:$0xff] %v54_v17  ;;  %v55_v18 = vld [vmem:[#allocation4 + $0x90] sm:$0xff]  ;;  %v56_v19 = vld [vmem:[#allocation4 + $0x98] sm:$0xff] }
  0x2f   :  { %v57_v20 = vld [vmem:[#allocation4 + $0xa0] sm:$0xff]  ;;  %119 = vst [vmem:[%s500_s2 + $0xa0] sm:$0xff] %v55_v18  ;;  %120 = vst [vmem:[%s500_s2 + $0xa8] sm:$0xff] %v56_v19  ;;  %v58_v21 = vld [vmem:[#allocation4 + $0xa8] sm:$0xff] }
  0x30   :  { %121 = vst [vmem:[%s500_s2 + $0xb0] sm:$0xff] %v57_v20  ;;  %v59_v22 = vld [vmem:[#allocation4 + $0xb0] sm:$0xff]  ;;  %v60_v23 = vld [vmem:[#allocation4 + $0xb8] sm:$0xff]  ;;  %122 = vst [vmem:[%s500_s2 + $0xb8] sm:$0xff] %v58_v21 }
  0x31   :  { %123 = vst [vmem:[%s500_s2 + $0xc0] sm:$0xff] %v59_v22  ;;  %124 = vst [vmem:[%s500_s2 + $0xc8] sm:$0xff] %v60_v23  ;;  %v61_v24 = vld [vmem:[#allocation4 + $0xc0] sm:$0xff]  ;;  %v62_v25 = vld [vmem:[#allocation4 + $0xc8] sm:$0xff] }
  0x32   :  { %v63_v26 = vld [vmem:[#allocation4 + $0xd0] sm:$0xff]  ;;  %125 = vst [vmem:[%s500_s2 + $0xd8] sm:$0xff] %v61_v24  ;;  %126 = vst [vmem:[%s500_s2 + $0xe0] sm:$0xff] %v62_v25  ;;  %v64_v27 = vld [vmem:[#allocation4 + $0xd8] sm:$0xff] }
  0x33   :  { %127 = vst [vmem:[%s500_s2 + $0xe8] sm:$0xff] %v63_v26  ;;  %v65_v28 = vld [vmem:[#allocation4 + $0xe0] sm:$0xff]  ;;  %v66_v29 = vld [vmem:[#allocation4 + $0xe8] sm:$0xff]  ;;  %128 = vst [vmem:[%s500_s2 + $0xf0] sm:$0xff] %v64_v27 }
  0x34   :  { %129 = vst [vmem:[%s500_s2 + $0xf8] sm:$0xff] %v65_v28  ;;  %130 = vst [vmem:[%s500_s2 + $0x100] sm:$0xff] %v66_v29  ;;  %v67_v30 = vld [vmem:[#allocation4 + $0xf0] sm:$0xff]  ;;  %v68_v31 = vld [vmem:[#allocation4 + $0xf8] sm:$0xff] }
  0x35   :  { %v69_v32 = vld [vmem:[#allocation4 + $0x100] sm:$0xff]  ;;  %131 = vst [vmem:[%s500_s2 + $0x108] sm:$0xff] %v67_v30  ;;  %132 = vst [vmem:[%s500_s2 + $0x110] sm:$0xff] %v68_v31  ;;  %v70_v33 = vld [vmem:[#allocation4 + $0x108] sm:$0xff] }
  0x36   :  { %133 = vst [vmem:[%s500_s2 + $0x120] sm:$0xff] %v69_v32  ;;  %v71_v34 = vld [vmem:[#allocation4 + $0x110] sm:$0xff]  ;;  %v72_v35 = vld [vmem:[#allocation4 + $0x118] sm:$0xff]  ;;  %134 = vst [vmem:[%s500_s2 + $0x128] sm:$0xff] %v70_v33 }
  0x37   :  { %135 = vst [vmem:[%s500_s2 + $0x130] sm:$0xff] %v71_v34  ;;  %136 = vst [vmem:[%s500_s2 + $0x138] sm:$0xff] %v72_v35  ;;  %v73_v36 = vld [vmem:[#allocation4 + $0x120] sm:$0xff]  ;;  %v74_v37 = vld [vmem:[#allocation4 + $0x128] sm:$0xff] }
  0x38   :  { %v75_v38 = vld [vmem:[#allocation4 + $0x130] sm:$0xff]  ;;  %137 = vst [vmem:[%s500_s2 + $0x140] sm:$0xff] %v73_v36  ;;  %138 = vst [vmem:[%s500_s2 + $0x148] sm:$0xff] %v74_v37  ;;  %v76_v39 = vld [vmem:[#allocation4 + $0x138] sm:$0xff] }
  0x39   :  { %139 = vst [vmem:[%s500_s2 + $0x150] sm:$0xff] %v75_v38  ;;  %v77_v40 = vld [vmem:[#allocation4 + $0x140] sm:$0xff]  ;;  %v78_v41 = vld [vmem:[#allocation4 + $0x148] sm:$0xff]  ;;  %140 = vst [vmem:[%s500_s2 + $0x158] sm:$0xff] %v76_v39 }
  0x3a   :  { %141 = vst [vmem:[%s500_s2 + $0x168] sm:$0xff] %v77_v40  ;;  %142 = vst [vmem:[%s500_s2 + $0x170] sm:$0xff] %v78_v41  ;;  %v79_v42 = vld [vmem:[#allocation4 + $0x150] sm:$0xff]  ;;  %v80_v43 = vld [vmem:[#allocation4 + $0x158] sm:$0xff] }
  0x3b   :  { %v81_v44 = vld [vmem:[#allocation4 + $0x160] sm:$0xff]  ;;  %143 = vst [vmem:[%s500_s2 + $0x178] sm:$0xff] %v79_v42  ;;  %144 = vst [vmem:[%s500_s2 + $0x180] sm:$0xff] %v80_v43  ;;  %v82_v45 = vld [vmem:[#allocation4 + $0x168] sm:$0xff] }
  0x3c   :  { %145 = vst [vmem:[%s500_s2 + $0x188] sm:$0xff] %v81_v44  ;;  %v83_v46 = vld [vmem:[#allocation4 + $0x170] sm:$0xff]  ;;  %v84_v47 = vld [vmem:[#allocation4 + $0x178] sm:$0xff]  ;;  %146 = vst [vmem:[%s500_s2 + $0x190] sm:$0xff] %v82_v45 }
  0x3d   :  { %147 = vst [vmem:[%s500_s2 + $0x198] sm:$0xff] %v83_v46  ;;  %148 = vst [vmem:[%s500_s2 + $0x1a0] sm:$0xff] %v84_v47  ;;  %v85_v48 = vld [vmem:[#allocation4 + $0x180] sm:$0xff]  ;;  %v86_v49 = vld [vmem:[#allocation4 + $0x188] sm:$0xff] }
  0x3e   :  { %v87_v50 = vld [vmem:[#allocation4 + $0x190] sm:$0xff]  ;;  %149 = vst [vmem:[%s500_s2 + $0x1b0] sm:$0xff] %v85_v48  ;;  %150 = vst [vmem:[%s500_s2 + $0x1b8] sm:$0xff] %v86_v49  ;;  %v88_v51 = vld [vmem:[#allocation4 + $0x198] sm:$0xff] }
  0x3f   :  { %151 = vst [vmem:[%s500_s2 + $0x1c0] sm:$0xff] %v87_v50  ;;  %v89_v52 = vld [vmem:[#allocation4 + $0x1a0] sm:$0xff]  ;;  %v90_v53 = vld [vmem:[#allocation4 + $0x1a8] sm:$0xff]  ;;  %152 = vst [vmem:[%s500_s2 + $0x1c8] sm:$0xff] %v88_v51 }
  0x40   :  { %153 = vst [vmem:[%s500_s2 + $0x1d0] sm:$0xff] %v89_v52  ;;  %154 = vst [vmem:[%s500_s2 + $0x1d8] sm:$0xff] %v90_v53  ;;  %v91_v54 = vld [vmem:[#allocation4 + $0x1b0] sm:$0xff]  ;;  %v92_v55 = vld [vmem:[#allocation4 + $0x1b8] sm:$0xff] }
  0x41   :  { %v93_v56 = vld [vmem:[#allocation4 + $0x1c0] sm:$0xff]  ;;  %155 = vst [vmem:[%s500_s2 + $0x1e0] sm:$0xff] %v91_v54  ;;  %156 = vst [vmem:[%s500_s2 + $0x1e8] sm:$0xff] %v92_v55  ;;  %v94_v57 = vld [vmem:[#allocation4 + $0x1c8] sm:$0xff] }
  0x42   :  { %157 = vst [vmem:[%s500_s2 + $0x1f8] sm:$0xff] %v93_v56  ;;  %v95_v58 = vld [vmem:[#allocation4 + $0x1d0] sm:$0xff]  ;;  %v96_v59 = vld [vmem:[#allocation4 + $0x1d8] sm:$0xff]  ;;  %158 = vst [vmem:[%s500_s2 + $0x200] sm:$0xff] %v94_v57 }
  0x43   :  { %159 = vst [vmem:[%s500_s2 + $0x208] sm:$0xff] %v95_v58  ;;  %160 = vst [vmem:[%s500_s2 + $0x210] sm:$0xff] %v96_v59  ;;  %v97_v60 = vld [vmem:[#allocation4 + $0x1e0] sm:$0xff]  ;;  %v98_v61 = vld [vmem:[#allocation4 + $0x1e8] sm:$0xff] }
  0x44   :  { %v99_v62 = vld [vmem:[#allocation4 + $0x1f0] sm:$0xff]  ;;  %161 = vst [vmem:[%s500_s2 + $0x218] sm:$0xff] %v97_v60  ;;  %162 = vst [vmem:[%s500_s2 + $0x220] sm:$0xff] %v98_v61  ;;  %v100_v63 = vld [vmem:[#allocation4 + $0x1f8] sm:$0xff] }
  0x45   :  { %163 = vst [vmem:[%s500_s2 + $0x228] sm:$0xff] %v99_v62  ;;  %v165_v0 = vld [vmem:[#allocation2] sm:$0xf]  ;;  %164 = vst [vmem:[%s500_s2 + $0x230] sm:$0xff] %v100_v63 }
  0x46   :  { %166 = vst [vmem:[%s500_s2 + $0x40] sm:$0xf] %v165_v0  ;;  %167 = vst [vmem:[%s500_s2 + $0x88] sm:$0xf] %v165_v0 }
  0x47   :  { %168 = vst [vmem:[%s500_s2 + $0xd0] sm:$0xf] %v165_v0  ;;  %169 = vst [vmem:[%s500_s2 + $0x118] sm:$0xf] %v165_v0 }
  0x48   :  { %170 = vst [vmem:[%s500_s2 + $0x160] sm:$0xf] %v165_v0  ;;  %171 = vst [vmem:[%s500_s2 + $0x1a8] sm:$0xf] %v165_v0 }
  0x49   :  { %172 = vst [vmem:[%s500_s2 + $0x1f0] sm:$0xf] %v165_v0  ;;  %173 = vst [vmem:[%s500_s2 + $0x238] sm:$0xf] %v165_v0 }
  0x4a   :  { %178 = vsyncpa [#allocation3], 1 }
  0x4b   :  { %179 = vsyncpa [#allocation5], 1 }

</bundles_post_ra>
